<compile_context>
chip_gen: v7x
topology: tpu7x:2x2x1
jax: 0.10.0
libtpu: 0.0.40
codegen_flags: <defaults>
</compile_context>

<pallas_src>
import jax
import jax.numpy as jnp
from jax.experimental import pallas as pl
from jax.experimental.pallas import tpu as pltpu


# ------------------------------ Pallas kernel ------------------------------ #
def _tv_kernel(x_ref, o_ref):
    # x_ref: (bp, H, W) block of image planes; o_ref: (1, 1) running sum.
    @pl.when(pl.program_id(0) == 0)
    def _():
        o_ref[...] = jnp.zeros_like(o_ref)

    v = x_ref[...].astype(jnp.float32)                      # (bp, H, W)
    total = jnp.float32(0.0)
    if v.shape[2] > 1:                                      # width-direction diffs
        total = total + jnp.sum(jnp.abs(v[:, :, :-1] - v[:, :, 1:]))
    if v.shape[1] > 1:                                      # height-direction diffs
        total = total + jnp.sum(jnp.abs(v[:, :-1, :] - v[:, 1:, :]))

    o_ref[...] = o_ref[...] + total


# --------------------------------- wrapper --------------------------------- #
def total_variation_loss(x):
    """x: (N, C, H, W) array -> scalar TV loss (float32)."""
    N, C, H, W = x.shape
    NC = N * C
    planes = x.reshape(NC, H, W).astype(jnp.float32)

    # Biggest plane block whose double-buffered input tile stays small (<~8 MiB).
    bytes_per_plane = H * W * 4
    bp = max(1, min(NC, (4 * 1024 * 1024) // max(bytes_per_plane, 1)))
    n_blocks = pl.cdiv(NC, bp)
    pad = n_blocks * bp - NC
    if pad:
        # Zero planes have zero total variation -> exact padding.
        planes = jnp.pad(planes, ((0, pad), (0, 0), (0, 0)))

    out = pl.pallas_call(
        _tv_kernel,
        out_shape=jax.ShapeDtypeStruct((1, 1), jnp.float32),
        grid=(n_blocks,),
        in_specs=[pl.BlockSpec((bp, H, W), lambda i: (i, 0, 0))],
        out_specs=pl.BlockSpec((1, 1), lambda i: (0, 0)),   # resident accumulator
        compiler_params=pltpu.CompilerParams(
            dimension_semantics=("arbitrary",),             # reduction axis
        ),
    )(planes)
    return out[0, 0]


# ----------------------------------- main ----------------------------------- #
if __name__ == "__main__":
    key = jax.random.PRNGKey(0)
    x = jax.random.normal(key, (2, 4, 16, 16), jnp.float32)

    loss = jax.jit(total_variation_loss)(x)
    jax.block_until_ready(loss)

    # Pure-JAX reference (identical to the torch forward).
    ref = (jnp.sum(jnp.abs(x[:, :, :, :-1] - x[:, :, :, 1:])) +
           jnp.sum(jnp.abs(x[:, :, :-1, :] - x[:, :, 1:, :])))
    assert jnp.allclose(loss, ref, rtol=1e-5, atol=1e-4), (loss, ref)

    print("KERNEL_OK")
</pallas_src>

<mosaic_0001>
module attributes {stable_mosaic.version = 11 : i64} {
  func.func @_tv_kernel(%arg0: i32, %arg1: memref<8x16x16xf32, #tpu.memory_space<vmem>>, %arg2: memref<1x1xf32, #tpu.memory_space<vmem>>) attributes {dimension_semantics = [#tpu.dimension_semantics<arbitrary>], iteration_bounds = array<i64: 1>, scalar_prefetch = 0 : i64, scratch_operands = 0 : i64, tpu.core_type = #tpu.core_type<tc>, window_params = [{transform_indices = @transform_0, window_bounds = array<i64: 8, 16, 16>}, {pipeline_mode = #tpu.pipeline_mode<synchronous>, transform_indices = @transform_1, window_bounds = array<i64: 1, 1>}]} {
    %c0_i32 = arith.constant 0 : i32
    %0 = arith.cmpi eq, %arg0, %c0_i32 : i32
    %1 = arith.extui %0 : i1 to i32
    %c0_i32_0 = arith.constant 0 : i32
    %2 = arith.cmpi ne, %1, %c0_i32_0 : i32
    scf.if %2 {
      %cst_9 = arith.constant 0.000000e+00 : f32
      %26 = vector.broadcast %cst_9 : f32 to vector<1x1xf32>
      %c0_10 = arith.constant 0 : index
      %c0_11 = arith.constant 0 : index
      %27 = vector.load %arg2[%c0_10, %c0_11] : memref<1x1xf32, #tpu.memory_space<vmem>>, vector<1x1xf32>
      tpu.vector_store %arg2[%c0_10, %c0_11], %26 {strides = array<i32>} : memref<1x1xf32, #tpu.memory_space<vmem>>, vector<1x1xf32>,
    } else {
    }
    %c0 = arith.constant 0 : index
    %c0_1 = arith.constant 0 : index
    %c0_2 = arith.constant 0 : index
    %3 = vector.load %arg1[%c0, %c0_1, %c0_2] : memref<8x16x16xf32, #tpu.memory_space<vmem>>, vector<8x16x16xf32>
    %4 = vector.extract_strided_slice %3 {offsets = [0, 0, 0], sizes = [8, 16, 15], strides = [1, 1, 1]} : vector<8x16x16xf32> to vector<8x16x15xf32>
    %5 = vector.extract_strided_slice %3 {offsets = [0, 0, 1], sizes = [8, 16, 15], strides = [1, 1, 1]} : vector<8x16x16xf32> to vector<8x16x15xf32>
    %6 = arith.subf %4, %5 : vector<8x16x15xf32>
    %7 = math.absf %6 : vector<8x16x15xf32>
    %8 = vector.shape_cast %7 : vector<8x16x15xf32> to vector<1x8x16x15xf32>
    %cst = arith.constant dense<0.000000e+00> : vector<1xf32>
    %9 = vector.multi_reduction <add>, %8, %cst [1, 2, 3] : vector<1x8x16x15xf32> to vector<1xf32>
    %10 = vector.shape_cast %9 : vector<1xf32> to vector<1x1x1x1xf32>
    %11 = vector.extract %10[0, 0, 0, 0] : f32 from vector<1x1x1x1xf32>
    %cst_3 = arith.constant 0.000000e+00 : f32
    %12 = arith.addf %cst_3, %11 : f32
    %13 = vector.extract_strided_slice %3 {offsets = [0, 0, 0], sizes = [8, 15, 16], strides = [1, 1, 1]} : vector<8x16x16xf32> to vector<8x15x16xf32>
    %14 = vector.extract_strided_slice %3 {offsets = [0, 1, 0], sizes = [8, 15, 16], strides = [1, 1, 1]} : vector<8x16x16xf32> to vector<8x15x16xf32>
    %15 = arith.subf %13, %14 : vector<8x15x16xf32>
    %16 = math.absf %15 : vector<8x15x16xf32>
    %17 = vector.shape_cast %16 : vector<8x15x16xf32> to vector<1x8x15x16xf32>
    %cst_4 = arith.constant dense<0.000000e+00> : vector<1xf32>
    %18 = vector.multi_reduction <add>, %17, %cst_4 [1, 2, 3] : vector<1x8x15x16xf32> to vector<1xf32>
    %19 = vector.shape_cast %18 : vector<1xf32> to vector<1x1x1x1xf32>
    %20 = vector.extract %19[0, 0, 0, 0] : f32 from vector<1x1x1x1xf32>
    %21 = arith.addf %12, %20 : f32
    %c0_5 = arith.constant 0 : index
    %c0_6 = arith.constant 0 : index
    %22 = vector.load %arg2[%c0_5, %c0_6] : memref<1x1xf32, #tpu.memory_space<vmem>>, vector<1x1xf32>
    %23 = vector.broadcast %21 : f32 to vector<1x1xf32>
    %24 = arith.addf %22, %23 : vector<1x1xf32>
    %c0_7 = arith.constant 0 : index
    %c0_8 = arith.constant 0 : index
    %25 = vector.load %arg2[%c0_7, %c0_8] : memref<1x1xf32, #tpu.memory_space<vmem>>, vector<1x1xf32>
    tpu.vector_store %arg2[%c0_7, %c0_8], %24 {strides = array<i32>} : memref<1x1xf32, #tpu.memory_space<vmem>>, vector<1x1xf32>,
    return
  }
  func.func @transform_0(%arg0: i32) -> (i32, i32, i32) {
    %c0_i32 = arith.constant 0 : i32
    %c0_i32_0 = arith.constant 0 : i32
    %c0_i32_1 = arith.constant 0 : i32
    return %arg0, %c0_i32, %c0_i32_0 : i32, i32, i32
  }
  func.func @transform_1(%arg0: i32) -> (i32, i32) {
    %c0_i32 = arith.constant 0 : i32
    %c0_i32_0 = arith.constant 0 : i32
    %c0_i32_1 = arith.constant 0 : i32
    return %c0_i32, %c0_i32_0 : i32, i32
  }
}

</mosaic_0001>

<bundles_post_ra>
// kernel: total_variation_loss.1
= control target key start
LH: loop header
LB: loop body
LE: loop exit
PB: predicated region body
PF: predicated region fallthrough
CT: control target
= control target key end

     0   :  { %6 = vsyncpa [#allocation3], 0  ;;  %s571_s0 = inlined_call_operand.hbm [shape: f32[8,16,16], index: 0, kind: input, shape index: {}]   ;;  %s572_s1 = inlined_call_operand.hbm [shape: f32[1,1], index: 1, kind: output, shape index: {}]  }
   0x1   :  { %7 = vsyncpa [#allocation4], 0  ;;  %s377_s6 = smov [#allocation2]   ;;  %s329_s10 = scalar_lea.hbm %s571_s0, 2048 }
   0x2   :  { %s13_s7 = sshll.u32 %s377_s6, 4  ;;  %p330_p0 = scmp.ne.s32.totalorder %s571_s0, %s329_s10  ;;  %s14_s7 = int_to_ptr.vmem [resolvable:$true] %s13_s7 }
   0x3   :  { %p333_p1 = scmp.lt.u32.totalorder %s329_s10, %s571_s0 }
   0x5   :  { %p335_p2 = pnand %p333_p1, %p330_p0 }
   0x7   :  { %338 = shalt.err (!%p335_p2)
}
   0x8   :  { %s339_s15 = scalar_lea.vmem %s14_s7, 2048  ;;  %p344_p4 = scmp.lt.s32.totalorder %s14_s7, %s14_s7 }
   0x9   :  { %p340_p3 = scmp.ne.s32.totalorder %s14_s7, %s339_s15  ;;  %p345_p5 = scmp.lt.s32.totalorder %s339_s15, %s339_s15 }
   0xb   :  { %p346_p6 = por %p345_p5, %p344_p4 }
   0xd   :  { %p347_p7 = pnand %p346_p6, %p340_p3 }
   0xf   :  { %350 = shalt.err (!%p347_p7)
}
  0x10   :  { %s378_s16 = smov 128   ;;  %s379_s17 = smov 8  }
  0x11   :  { %19 = dma.hbm_to_vmem [thread:$0]  %s571_s0, 2048, %s14_s7, [#allocation3], %s378_s16, %s378_s16, %s379_s17  }
  0x12   :  { %373 = dma.done.wait [#allocation3], 2048  }
  0x13   :  { %374 = vsyncadd [#allocation3], 4294965248  ;;  %v405_v0 = vld [vmem:[#allocation2] sm:$0xff]  ;;  %v407_v1 = vld [vmem:[#allocation2 + $0x10] sm:$0xff]  ;;  %vm183_vm0 = vcmask 1046528   ;;  %s380_s20 = smov 127  }
  0x14   :  { %v409_v2 = vld [vmem:[#allocation2 + $0x8] sm:$0xff]  ;;  %61 = vrot.lane.b32.xlu0 %v405_v0, %s380_s20  ;;  %v184_v3 = vrot.slane %v405_v0, 1  ;;  %65 = vrot.lane.b32.xlu1 %v407_v1, %s380_s20  ;;  %v187_v4 = vrot.slane %v407_v1, 1  ;;  %v418_v6 = vld [vmem:[#allocation2 + $0x18] sm:$0xff]  ;;  %v420_v7 = vld [vmem:[#allocation2 + $0x20] sm:$0xff]  ;;  %vm258_vm1 = vcmask 129024  }
  0x15   :  { %v185_v5 = vrot.slane %v409_v2, 1  ;;  %v422_v8 = vld [vmem:[#allocation2 + $0x28] sm:$0xff]  ;;  %v188_v9 = vrot.slane %v418_v6, 1  ;;  %v190_v10 = vrot.slane %v420_v7, 1  ;;  %vm256_vm2 = vcmask 130048   ;;  %v439_v23 = vld [vmem:[#allocation2 + $0x30] sm:$0xff] }
  0x16   :  { %v191_v11 = vrot.slane %v422_v8, 1  ;;  %v441_v24 = vld [vmem:[#allocation2 + $0x38] sm:$0xff]  ;;  %v193_v27 = vrot.slane %v439_v23, 1  ;;  %v461_v41 = vld [vmem:[#allocation2 + $0x40] sm:$0xff]  ;;  %v463_v42 = vld [vmem:[#allocation2 + $0x48] sm:$0xff]  ;;  %vm141_vm3 = vcmask 121856  }
  0x17   :  { %v225_v12 = vsub.f32 %v409_v2, %v185_v5  ;;  %v186_v13 = vsel %vm183_vm0, %v184_v3, %v185_v5  ;;  %v227_v15 = vsub.f32 %v418_v6, %v188_v9  ;;  %v189_v16 = vsel %vm183_vm0, %v187_v4, %v188_v9  ;;  %v473_v49 = vld [vmem:[#allocation2 + $0x50] sm:$0xff]  ;;  %v475_v50 = vld [vmem:[#allocation2 + $0x58] sm:$0xff]  ;;  %v484_v56 = vld [vmem:[#allocation2 + $0x60] sm:$0xff]  ;;  %s382_s23 = smov [#allocation5]  }
  0x18   :  { %v224_v14 = vsub.f32 %v405_v0, %v186_v13  ;;  %v192_v17 = vsel %vm183_vm0, %v190_v10, %v191_v11  ;;  %63 = vrot.lane.b32.xlu0 %v409_v2, %s380_s20  ;;  %67 = vrot.lane.b32.xlu1 %v418_v6, %s380_s20  ;;  %v226_v19 = vsub.f32 %v407_v1, %v189_v16  ;;  %v194_v28 = vrot.slane %v441_v24, 1  ;;  %v486_v57 = vld [vmem:[#allocation2 + $0x68] sm:$0xff]  ;;  %v496_v3 = vld [vmem:[#allocation2 + $0x70] sm:$0xff]  ;;  %v498_v4 = vld [vmem:[#allocation2 + $0x78] sm:$0xff]  ;;  %s310_s24 = sshll.u32 %s382_s23, 4  ;;  %s311_s24 = int_to_ptr.vmem [resolvable:$true] %s310_s24 }
  0x19   :  { %v241_v18 = vand.u32 2147483647, %v225_v12  ;;  %v243_v21 = vand.u32 2147483647, %v227_v15  ;;  %v228_v22 = vsub.f32 %v420_v7, %v192_v17  ;;  %v229_v33 = vsub.f32 %v422_v8, %v191_v11  ;;  %s351_s25 = scalar_lea.vmem %s311_s24, 16  ;;  %s355_s26 = scalar_lea.vmem %s311_s24, 32 }
  0x1a   :  { %v240_v20 = vand.u32 2147483647, %v224_v14  ;;  %v242_v26 = vand.u32 2147483647, %v226_v19  ;;  %v195_v36 = vsel %vm183_vm0, %v193_v27, %v194_v28  ;;  %v196_v43 = vrot.slane %v461_v41, 1  ;;  %p352_p8 = scmp.ne.s32.totalorder %s311_s24, %s351_s25  ;;  %p356_p9 = scmp.lt.s32.totalorder %s311_s24, %s311_s24 }
  0x1b   :  { %v259_v25 = vsel %vm258_vm1, %v241_v18, 0.0  ;;  %v263_v32 = vsel %vm258_vm1, %v243_v21, 0.0  ;;  %v244_v34 = vand.u32 2147483647, %v228_v22  ;;  %v245_v38 = vand.u32 2147483647, %v229_v33  ;;  %p357_p10 = scmp.lt.s32.totalorder %s355_s26, %s351_s25 }
  0x1c   :  { %v257_v29 = vsel %vm256_vm2, %v240_v20, 0.0  ;;  %v261_v31 = vsel %vm256_vm2, %v242_v26, 0.0  ;;  %69 = vrot.lane.b32.xlu0 %v420_v7, %s380_s20  ;;  %71 = vrot.lane.b32.xlu1 %v422_v8, %s380_s20  ;;  %v230_v40 = vsub.f32 %v439_v23, %v195_v36  ;;  %v197_v44 = vrot.slane %v463_v42, 1 }
  0x1d   :  { %v260_v30 = vadd.f32 %v259_v25, %v257_v29  ;;  %v265_v39 = vsel %vm256_vm2, %v244_v34, 0.0  ;;  %v267_v46 = vsel %vm258_vm1, %v245_v38, 0.0  ;;  %v231_v47 = vsub.f32 %v441_v24, %v194_v28  ;;  %p358_p11 = por %p357_p10, %p356_p9 }
  0x1e   :  { %v246_v48 = vand.u32 2147483647, %v230_v40  ;;  %v198_v51 = vsel %vm183_vm0, %v196_v43, %v197_v44  ;;  %v199_v58 = vrot.slane %v473_v49, 1  ;;  %v200_v59 = vrot.slane %v475_v50, 1 }
  0x1f   :  { %v262_v35 = vadd.f32 %v261_v31, %v260_v30  ;;  %v247_v53 = vand.u32 2147483647, %v231_v47  ;;  %v232_v55 = vsub.f32 %v461_v41, %v198_v51  ;;  %v233_v62 = vsub.f32 %v463_v42, %v197_v44  ;;  %p359_p12 = pnand %p358_p11, %p352_p8 }
  0x20   :  { %73 = vrot.lane.b32.xlu0 %v439_v23, %s380_s20  ;;  %75 = vrot.lane.b32.xlu1 %v441_v24, %s380_s20  ;;  %v269_v54 = vsel %vm256_vm2, %v246_v48, 0.0  ;;  %v201_v5 = vsel %vm183_vm0, %v199_v58, %v200_v59  ;;  %v202_v13 = vrot.slane %v484_v56, 1  ;;  %v203_v14 = vrot.slane %v486_v57, 1 }
  0x21   :  { %v264_v37 = vadd.f32 %v263_v32, %v262_v35  ;;  %v271_v61 = vsel %vm258_vm1, %v247_v53, 0.0  ;;  %v248_v63 = vand.u32 2147483647, %v232_v55  ;;  %v249_v10 = vand.u32 2147483647, %v233_v62 }
  0x22   :  { %v234_v12 = vsub.f32 %v473_v49, %v201_v5  ;;  %v235_v17 = vsub.f32 %v475_v50, %v200_v59  ;;  %v204_v19 = vsel %vm183_vm0, %v202_v13, %v203_v14  ;;  %v205_v26 = vrot.slane %v496_v3, 1 }
  0x23   :  { %v266_v45 = vadd.f32 %v265_v39, %v264_v37  ;;  %v273_v11 = vsel %vm256_vm2, %v248_v63, 0.0  ;;  %v275_v16 = vsel %vm258_vm1, %v249_v10, 0.0  ;;  %v236_v22 = vsub.f32 %v484_v56, %v204_v19 }
  0x24   :  { %77 = vrot.lane.b32.xlu0 %v461_v41, %s380_s20  ;;  %79 = vrot.lane.b32.xlu1 %v463_v42, %s380_s20  ;;  %v250_v18 = vand.u32 2147483647, %v234_v12  ;;  %v251_v21 = vand.u32 2147483647, %v235_v17  ;;  %v206_v27 = vrot.slane %v498_v4, 1  ;;  %v237_v30 = vsub.f32 %v486_v57, %v203_v14 }
  0x25   :  { %v268_v52 = vadd.f32 %v267_v46, %v266_v45  ;;  %v252_v31 = vand.u32 2147483647, %v236_v22  ;;  %vm27_vm4 = vcmask 0  }
  0x26   :  { %v277_v25 = vsel %vm256_vm2, %v250_v18, 0.0  ;;  %v279_v29 = vsel %vm258_vm1, %v251_v21, 0.0  ;;  %v207_v32 = vsel %vm183_vm0, %v205_v26, %v206_v27  ;;  %v253_v34 = vand.u32 2147483647, %v237_v30 }
  0x27   :  { %v270_v60 = vadd.f32 %v269_v54, %v268_v52  ;;  %v238_v35 = vsub.f32 %v496_v3, %v207_v32  ;;  %v281_v36 = vsel %vm256_vm2, %v252_v31, 0.0  ;;  %v239_v38 = vsub.f32 %v498_v4, %v206_v27 }
  0x28   :  { %81 = vrot.lane.b32.xlu0 %v473_v49, %s380_s20  ;;  %83 = vrot.lane.b32.xlu1 %v475_v50, %s380_s20  ;;  %v283_v40 = vsel %vm258_vm1, %v253_v34, 0.0 }
  0x29   :  { %v272_v9 = vadd.f32 %v271_v61, %v270_v60  ;;  %v254_v39 = vand.u32 2147483647, %v238_v35  ;;  %v255_v44 = vand.u32 2147483647, %v239_v38 }
  0x2b   :  { %v274_v15 = vadd.f32 %v273_v11, %v272_v9  ;;  %v285_v45 = vsel %vm256_vm2, %v254_v39, 0.0  ;;  %v287_v47 = vsel %vm258_vm1, %v255_v44, 0.0 }
  0x2c   :  { %85 = vrot.lane.b32.xlu0 %v484_v56, %s380_s20  ;;  %87 = vrot.lane.b32.xlu1 %v486_v57, %s380_s20 }
  0x2d   :  { %v276_v20 = vadd.f32 %v275_v16, %v274_v15 }
  0x2f   :  { %v278_v28 = vadd.f32 %v277_v25, %v276_v20 }
  0x30   :  { %89 = vrot.lane.b32.xlu0 %v496_v3, %s380_s20  ;;  %91 = vrot.lane.b32.xlu1 %v498_v4, %s380_s20 }
  0x31   :  { %v280_v33 = vadd.f32 %v279_v29, %v278_v28 }
  0x33   :  { %v282_v37 = vadd.f32 %v281_v36, %v280_v33 }
  0x35   :  { %v284_v43 = vadd.f32 %v283_v40, %v282_v37 }
  0x37   :  { %v286_v46 = vadd.f32 %v285_v45, %v284_v43 }
  0x39   :  { %v288_v48 = vadd.f32 %v287_v47, %v286_v46 }
  0x54   :  { %289 = vadd.xlane.f32.xlu1 %v288_v48 }
  0x86   :  { %v62_v51 = vpop.permute.xlu0 %61  ;;  %v66_v52 = vpop.permute.xlu1 %65 }
  0x87   :  { %v109_v53 = vsub.f32 %v405_v0, %v62_v51  ;;  %v111_v54 = vsub.f32 %v407_v1, %v66_v52 }
  0x89   :  { %v125_v59 = vand.u32 2147483647, %v109_v53  ;;  %v127_v62 = vand.u32 2147483647, %v111_v54 }
  0x8a   :  { %v64_v55 = vpop.permute.xlu0 %63  ;;  %v68_v58 = vpop.permute.xlu1 %67 }
  0x8b   :  { %v110_v60 = vsub.f32 %v409_v2, %v64_v55  ;;  %v112_v61 = vsub.f32 %v418_v6, %v68_v58  ;;  %v142_v11 = vsel %vm141_vm3, %v125_v59, 0.0  ;;  %v145_v14 = vsel %vm141_vm3, %v127_v62, 0.0 }
  0x8d   :  { %v126_v63 = vand.u32 2147483647, %v110_v60  ;;  %v128_v5 = vand.u32 2147483647, %v112_v61 }
  0x8e   :  { %v70_v9 = vpop.permute.xlu0 %69  ;;  %v72_v10 = vpop.permute.xlu1 %71 }
  0x8f   :  { %v143_v12 = vsel %vm141_vm3, %v126_v63, 0.0  ;;  %v113_v0 = vsub.f32 %v420_v7, %v70_v9  ;;  %v114_v1 = vsub.f32 %v422_v8, %v72_v10  ;;  %v147_v2 = vsel %vm141_vm3, %v128_v5, 0.0 }
  0x90   :  { %v144_v13 = vadd.f32 %v143_v12, %v142_v11 }
  0x91   :  { %v129_v6 = vand.u32 2147483647, %v113_v0  ;;  %v130_v15 = vand.u32 2147483647, %v114_v1  ;;  %v381_v1 = vmov 0.0  }
  0x92   :  { %v146_v16 = vadd.f32 %v145_v14, %v144_v13  ;;  %v74_v17 = vpop.permute.xlu0 %73  ;;  %v76_v18 = vpop.permute.xlu1 %75  ;;  %28 = vst.msk [vmem:[#allocation5] sm:$0x1] %vm27_vm4, %v381_v1 }
  0x93   :  { %v149_v19 = vsel %vm141_vm3, %v129_v6, 0.0  ;;  %v115_v20 = vsub.f32 %v439_v23, %v74_v17  ;;  %v116_v21 = vsub.f32 %v441_v24, %v76_v18  ;;  %v151_v7 = vsel %vm141_vm3, %v130_v15, 0.0 }
  0x94   :  { %v148_v22 = vadd.f32 %v147_v2, %v146_v16 }
  0x95   :  { %v131_v8 = vand.u32 2147483647, %v115_v20  ;;  %v132_v25 = vand.u32 2147483647, %v116_v21 }
  0x96   :  { %v150_v26 = vadd.f32 %v149_v19, %v148_v22  ;;  %v78_v27 = vpop.permute.xlu0 %77  ;;  %v80_v28 = vpop.permute.xlu1 %79 }
  0x97   :  { %v153_v29 = vsel %vm141_vm3, %v131_v8, 0.0  ;;  %v117_v30 = vsub.f32 %v461_v41, %v78_v27  ;;  %v118_v31 = vsub.f32 %v463_v42, %v80_v28  ;;  %v155_v33 = vsel %vm141_vm3, %v132_v25, 0.0 }
  0x98   :  { %v152_v32 = vadd.f32 %v151_v7, %v150_v26 }
  0x99   :  { %v133_v23 = vand.u32 2147483647, %v117_v30  ;;  %v134_v34 = vand.u32 2147483647, %v118_v31  ;;  %v299_v7 = vld [vmem:[#allocation5] sm:$0x1] }
  0x9a   :  { %v154_v24 = vadd.f32 %v153_v29, %v152_v32  ;;  %v82_v35 = vpop.permute.xlu0 %81  ;;  %v84_v36 = vpop.permute.xlu1 %83 }
  0x9b   :  { %v157_v37 = vsel %vm141_vm3, %v133_v23, 0.0  ;;  %v119_v38 = vsub.f32 %v473_v49, %v82_v35  ;;  %v120_v39 = vsub.f32 %v475_v50, %v84_v36  ;;  %v159_v43 = vsel %vm141_vm3, %v134_v34, 0.0 }
  0x9c   :  { %v156_v40 = vadd.f32 %v155_v33, %v154_v24 }
  0x9d   :  { %v135_v41 = vand.u32 2147483647, %v119_v38  ;;  %v136_v44 = vand.u32 2147483647, %v120_v39 }
  0x9e   :  { %v158_v42 = vadd.f32 %v157_v37, %v156_v40  ;;  %v86_v45 = vpop.permute.xlu0 %85  ;;  %v88_v46 = vpop.permute.xlu1 %87 }
  0x9f   :  { %v161_v47 = vsel %vm141_vm3, %v135_v41, 0.0  ;;  %v121_v48 = vsub.f32 %v484_v56, %v86_v45  ;;  %v122_v51 = vsub.f32 %v486_v57, %v88_v46  ;;  %v163_v53 = vsel %vm141_vm3, %v136_v44, 0.0 }
  0xa0   :  { %v160_v52 = vadd.f32 %v159_v43, %v158_v42 }
  0xa1   :  { %v137_v49 = vand.u32 2147483647, %v121_v48  ;;  %v138_v54 = vand.u32 2147483647, %v122_v51 }
  0xa2   :  { %v162_v50 = vadd.f32 %v161_v47, %v160_v52  ;;  %v90_v55 = vpop.permute.xlu0 %89  ;;  %v92_v58 = vpop.permute.xlu1 %91 }
  0xa3   :  { %v165_v59 = vsel %vm141_vm3, %v137_v49, 0.0  ;;  %v123_v60 = vsub.f32 %v496_v3, %v90_v55  ;;  %v124_v61 = vsub.f32 %v498_v4, %v92_v58  ;;  %v167_v63 = vsel %vm141_vm3, %v138_v54, 0.0 }
  0xa4   :  { %v164_v62 = vadd.f32 %v163_v53, %v162_v50 }
  0xa5   :  { %v139_v56 = vand.u32 2147483647, %v123_v60  ;;  %v140_v5 = vand.u32 2147483647, %v124_v61 }
  0xa6   :  { %v166_v57 = vadd.f32 %v165_v59, %v164_v62 }
  0xa7   :  { %v169_v9 = vsel %vm141_vm3, %v139_v56, 0.0  ;;  %v171_v11 = vsel %vm141_vm3, %v140_v5, 0.0 }
  0xa8   :  { %v168_v10 = vadd.f32 %v167_v63, %v166_v57 }
  0xaa   :  { %v170_v12 = vadd.f32 %v169_v9, %v168_v10 }
  0xac   :  { %v172_v0 = vadd.f32 %v171_v11, %v170_v12 }
  0xae   :  { %173 = vadd.xlane.f32.xlu0 %v172_v0 }
  0xe1   :  { %v290_v3 = vpop.xlane.xlu1 %289 }
  0xe2   :  { %v291_v4 = vrot.slane %v290_v3, 4 }
  0xe4   :  { %v292_v13 = vadd.f32 %v291_v4, %v290_v3 }
  0xe6   :  { %v293_v14 = vrot.slane %v292_v13, 2 }
  0xe8   :  { %v294_v16 = vadd.f32 %v293_v14, %v292_v13 }
  0xea   :  { %v295_v19 = vrot.slane %v294_v16, 1 }
  0xec   :  { %v296_v22 = vadd.f32 %v295_v19, %v294_v16 }
 0x13b   :  { %v174_v2 = vpop.xlane.xlu0 %173 }
 0x13c   :  { %v175_v6 = vrot.slane %v174_v2, 4 }
 0x13e   :  { %v176_v15 = vadd.f32 %v175_v6, %v174_v2 }
 0x140   :  { %v177_v17 = vrot.slane %v176_v15, 2 }
 0x142   :  { %v178_v18 = vadd.f32 %v177_v17, %v176_v15 }
 0x144   :  { %v179_v20 = vrot.slane %v178_v18, 1 }
 0x146   :  { %v180_v21 = vadd.f32 %v179_v20, %v178_v18 }
 0x148   :  { %319 = vpush %v180_v21 }
 0x149   :  { %321 = vpush %v296_v22 }
 0x179   :  { %s320_s0 = spop %319 }
 0x17a   :  { %s322_s21 = spop %321 }
 0x17b   :  { %s298_s22 = sadd.f32 %s322_s21, %s320_s0 }
 0x17d   :  { %v300_v8 = vstv %s298_s22 }
 0x17e   :  { %v301_v25 = vadd.f32 %v300_v8, %v299_v7 }
 0x180   :  { %303 = vst.msk [vmem:[#allocation5] sm:$0x1] %vm27_vm4, %v301_v25 }
 0x181   :  { %362 = shalt.err (!%p359_p12)
}
 0x182   :  { %s363_s29 = scalar_lea.hbm %s572_s1, 16 }
 0x183   :  { %p364_p13 = scmp.ne.s32.totalorder %s572_s1, %s363_s29  ;;  %p367_p0 = scmp.lt.u32.totalorder %s363_s29, %s572_s1 }
 0x185   :  { %p369_p1 = pnand %p367_p0, %p364_p13 }
 0x187   :  { %372 = shalt.err (!%p369_p1)
}
 0x188   :  { %313 = dma.vmem_to_hbm [thread:$0]  %s311_s24, 16, %s572_s1, [#allocation4]  }
 0x189   :  { %375 = dma.done.wait [#allocation4], 16  }
 0x18a   :  { %376 = vsyncadd [#allocation4], 4294967280 }
 0x18b   :  { %317 = vsyncpa [#allocation3], 1 }
 0x18c   :  { %318 = vsyncpa [#allocation4], 1 }

</bundles_post_ra>
